<compile_context>
chip_gen: v6e
topology: v6e:2x2x1
jax: 0.10.0
libtpu: 0.0.40
codegen_flags: <defaults>
</compile_context>

<pallas_src>
import functools
import math

import jax
import jax.numpy as jnp
from jax.experimental import pallas as pl
from jax.experimental.pallas import tpu as pltpu

BN_EPS = 1e-5
LANE = 128


def residual_kernel(x_ref, w_ref, gamma_ref, beta_ref, x_cp_ref, out_ref, *,
                    n_y, matmul_dtype, fuse):
    # x_ref:     (N, I)  f32, resident across all grid steps (constant block index)
    # w_ref:     (I, tn) matmul_dtype column slab, double-buffered by the pipeline
    # gamma_ref: (1, tn) f32
    # beta_ref:  (1, tn) f32
    # x_cp_ref:  (N, tn) f32 column slab of x (fused path) -- passthrough copy source
    # out_ref:   (N, tn) f32 lane-dense output slab of the (N, O+I) result
    j = pl.program_id(0)

    def compute():
        x = x_ref[...]
        # MXU matmul: bf16 inputs (native on v5e/v6e/v7x), f32 accumulate.
        h = jnp.dot(x.astype(matmul_dtype), w_ref[...],
                    preferred_element_type=jnp.float32)             # (N, tn) f32

        # Train-mode BatchNorm1d batch statistics (biased variance).  Two-pass variance:
        # robust against the E[h^2] - mean^2 catastrophic cancellation.
        inv_n = 1.0 / x.shape[0]
        mean = jnp.sum(h, axis=0, keepdims=True) * inv_n             # (1, tn)
        centered = h - mean
        var = jnp.sum(centered * centered, axis=0, keepdims=True) * inv_n

        # Fused BN affine + ReLU: relu(centered * (gamma * rsqrt(var+eps)) + beta).
        scale = gamma_ref[...] * jax.lax.rsqrt(var + BN_EPS)         # rsqrt -> EUP
        out_ref[...] = jnp.maximum(centered * scale + beta_ref[...], 0.0)
        # TODO(synk): for very large N*tn (>~64K f32 elems) strip-loop this epilogue over
        # 8-row slabs to bound vreg pressure; unnecessary at these shapes.

    if fuse:
        pl.when(j < n_y)(compute)

        @pl.when(j >= n_y)
        def _copy_passthrough():
            # torch.cat([out, input], dim=1): store-only slab copy of the original f32 x
            # into columns [O, O+I) -- no extra XLA concat pass over the kernel's output.
            out_ref[...] = x_cp_ref[...]
    else:
        compute()


def _vmem_limit_bytes():
    """~75% of physical VMEM: ~96 MiB on v5e/v6e (128 MiB), ~48 MiB on v7x (64 MiB/TC)."""
    cap = 64 * 1024 * 1024  # conservative default (v7x per-TC)
    try:
        info = pltpu.get_tpu_info()
        cap = int(getattr(info, "vmem_capacity_bytes", cap) or cap)
    except Exception:
        pass
    return (cap * 3) // 4


def _lane_divisors(v):
    """Multiples of 128 that divide v, descending."""
    out = []
    d = (v // LANE) * LANE
    while d >= LANE:
        if v % d == 0:
            out.append(d)
        d -= LANE
    return out


def _pick_feature_tile(n, i, col_extent, wbytes, vmem_budget, max_tn=None):
    """Largest lane-aligned tn dividing col_extent whose per-step VMEM footprint fits the
    budget; softly prefers N*tn <= 64K f32 elements to bound vreg pressure."""
    cands = _lane_divisors(col_extent)
    if max_tn is not None:
        cands = [t for t in cands if t <= max_tn] or cands[-1:]

    def footprint(tn):
        x_res = 2 * n * i * 4            # resident f32 x (double-buffered by the pipeline)
        w_db = 2 * i * tn * wbytes       # streamed weight slab, double-buffered
        gb_db = 2 * 2 * tn * 4           # gamma/beta slabs
        x_cp = 2 * n * tn * 4            # passthrough copy-source slab
        out_db = 2 * n * tn * 4          # output slab
        live = 3 * n * tn * 4            # h / centered / misc live values
        return x_res + w_db + gb_db + x_cp + out_db + live

    fits = [t for t in cands if footprint(t) <= vmem_budget]
    if not fits:
        return cands[-1]                 # smallest lane-aligned divisor
    soft = [t for t in fits if n * t <= 64 * 1024]
    return (soft or fits)[0]


def residual_forward(x, w, gamma, beta, *, matmul_dtype=jnp.bfloat16):
    """x: (N, I) f32; w: (I, O) f32; gamma/beta: (O,) f32  ->  (N, O + I) f32.

    Matches Residual.forward with BatchNorm1d in training mode (batch statistics).
    The Linear bias is intentionally not an argument: it cancels exactly under train-mode
    batch normalization (see module docstring).
    """
    n, i = x.shape
    o = w.shape[1]
    x = x.astype(jnp.float32)
    w = w.astype(matmul_dtype)
    gamma2 = gamma.reshape(1, o).astype(jnp.float32)
    beta2 = beta.reshape(1, o).astype(jnp.float32)
    wbytes = jnp.dtype(matmul_dtype).itemsize

    vmem_limit = _vmem_limit_bytes()
    fuse = (o % LANE == 0) and (i % LANE == 0)

    if fuse:
        # tn divides gcd(O, I) so the same block width tiles both the compute region
        # [0, O) and the passthrough region [O, O+I) of the fused output.
        tn = _pick_feature_tile(n, i, math.gcd(o, i), wbytes, vmem_limit)
        n_y, n_x = o // tn, i // tn
        out_cols = o + i
        o_pad = o
    else:
        # Fallback: pad compute columns to a lane-dense width (unmasked vst), concat outside.
        o_pad = ((o + LANE - 1) // LANE) * LANE
        max_tn = o_pad // 2 if o_pad >= 2 * LANE else None  # >=2 grid steps for v7x's 2 TCs
        tn = _pick_feature_tile(n, i, o_pad, wbytes, vmem_limit, max_tn=max_tn)
        n_y, n_x = o_pad // tn, 0
        out_cols = o_pad
        if o_pad != o:
            w = jnp.pad(w, ((0, 0), (0, o_pad - o)))
            gamma2 = jnp.pad(gamma2, ((0, 0), (0, o_pad - o)), constant_values=1.0)
            beta2 = jnp.pad(beta2, ((0, 0), (0, o_pad - o)))

    grid = (n_y + n_x,)
    vmem = pltpu.MemorySpace.VMEM

    # Clamp w/gamma/beta block index on copy steps -> their blocks are not re-DMA'd there.
    w_idx = lambda j: (0, jnp.minimum(j, n_y - 1))
    if fuse:
        x_cp_spec = pl.BlockSpec((n, tn), lambda j: (0, jnp.maximum(j - n_y, 0)),
                                 memory_space=vmem)
    else:
        x_cp_spec = pl.BlockSpec((n, i), lambda j: (0, 0), memory_space=vmem)  # unused

    kernel = functools.partial(residual_kernel, n_y=n_y,
                               matmul_dtype=matmul_dtype, fuse=fuse)

    flops = 2 * n * i * o_pad
    bytes_accessed = (2 * n * i * 4 + i * o_pad * wbytes + 2 * o_pad * 4
                      + n * out_cols * 4)

    y = pl.pallas_call(
        kernel,
        out_shape=jax.ShapeDtypeStruct((n, out_cols), jnp.float32),
        grid_spec=pltpu.PrefetchScalarGridSpec(
            num_scalar_prefetch=0,
            grid=grid,
            in_specs=[
                # x: same block every step -> stays resident in VMEM, no re-DMA.
                pl.BlockSpec((n, i), lambda j: (0, 0), memory_space=vmem),
                pl.BlockSpec((i, tn), w_idx, memory_space=vmem),   # weight column slab
                pl.BlockSpec((1, tn), w_idx, memory_space=vmem),   # gamma
                pl.BlockSpec((1, tn), w_idx, memory_space=vmem),   # beta
                x_cp_spec,                                         # passthrough copy source
            ],
            out_specs=pl.BlockSpec((n, tn), lambda j: (0, j), memory_space=vmem),
        ),
        compiler_params=pltpu.CompilerParams(
            # Every grid step is independent (batch stats use the whole batch per tile),
            # so the axis is parallel -> v7x shards compute+copy tiles across its 2 TCs.
            dimension_semantics=("parallel",),
            vmem_limit_bytes=vmem_limit,
        ),
        cost_estimate=pl.CostEstimate(flops=flops, transcendentals=o_pad,
                                      bytes_accessed=bytes_accessed),
    )(x, w, gamma2, beta2, x)

    if fuse:
        return y
    # TODO(synk): K-tiling (input-feature grid axis + f32 accumulator) for very large I on
    # v7x; at these shapes the budget-driven tn already keeps the footprint in VMEM.
    return jnp.concatenate([y[:, :o], x], axis=1)


def residual_reference(x, w, b, gamma, beta):
    # Faithful reference INCLUDING the Linear bias, to demonstrate the cancellation.
    h = x @ w + b
    mean = jnp.mean(h, axis=0, keepdims=True)
    var = jnp.mean((h - mean) ** 2, axis=0, keepdims=True)
    bn = (h - mean) * jax.lax.rsqrt(var + BN_EPS) * gamma + beta
    return jnp.concatenate([jnp.maximum(bn, 0.0), x], axis=1)


if __name__ == "__main__":
    key = jax.random.PRNGKey(0)
    kx, kw, kb, kg, kbe = jax.random.split(key, 5)

    # Main (fused-concat) case: lane-aligned i/o, small batch.
    N, I, O = 8, 128, 256
    x = jax.random.normal(kx, (N, I), dtype=jnp.float32)
    bound = 1.0 / math.sqrt(I)  # PyTorch Linear-style init bound
    w = jax.random.uniform(kw, (I, O), jnp.float32, -bound, bound)
    b = jax.random.uniform(kb, (O,), jnp.float32, -bound, bound)
    gamma = jax.random.uniform(kg, (O,), jnp.float32, 0.5, 1.5)
    beta = 0.1 * jax.random.normal(kbe, (O,), dtype=jnp.float32)

    y_ref = residual_reference(x, w, b, gamma, beta)

    # f32 matmul path: tight check of the kernel math (incl. bias cancellation, fused concat).
    y32 = residual_forward(x, w, gamma, beta, matmul_dtype=jnp.float32)
    jax.block_until_ready(y32)
    assert y32.shape == (N, O + I), y32.shape
    assert jnp.allclose(y32, y_ref, atol=1e-3, rtol=1e-3), float(jnp.max(jnp.abs(y32 - y_ref)))

    # Default bf16 matmul path (halved streamed weight bytes, MXU-native).
    ybf = residual_forward(x, w, gamma, beta)
    jax.block_until_ready(ybf)
    assert ybf.shape == (N, O + I), ybf.shape
    assert jnp.allclose(ybf, y_ref, atol=5e-2, rtol=5e-2), float(jnp.max(jnp.abs(ybf - y_ref)))
    # Passthrough columns must be bit-exact (concat fused in-kernel from the untouched f32 x).
    assert bool(jnp.array_equal(ybf[:, O:], x))

    # Non-lane-aligned fallback path (padded compute + external concat).
    N2, I2, O2 = 6, 48, 80
    x2 = jax.random.normal(kx, (N2, I2), dtype=jnp.float32)
    b2 = 1.0 / math.sqrt(I2)
    w2 = jax.random.uniform(kw, (I2, O2), jnp.float32, -b2, b2)
    y2 = residual_forward(x2, w2, jnp.ones((O2,), jnp.float32), jnp.zeros((O2,), jnp.float32),
                          matmul_dtype=jnp.float32)
    jax.block_until_ready(y2)
    y2_ref = residual_reference(x2, w2, jnp.zeros((O2,), jnp.float32),
                                jnp.ones((O2,), jnp.float32), jnp.zeros((O2,), jnp.float32))
    assert y2.shape == (N2, O2 + I2), y2.shape
    assert jnp.allclose(y2, y2_ref, atol=1e-3, rtol=1e-3), float(jnp.max(jnp.abs(y2 - y2_ref)))

    # TODO(synk): BatchNorm1d running_mean/running_var updates (training-time side effect)
    # are not materialized; only the forward output is produced, matching the module return.
    print("KERNEL_OK")
</pallas_src>

<mosaic_0001>
module attributes {stable_mosaic.version = 11 : i64} {
  func.func @residual_kernel(%arg0: i32, %arg1: memref<8x128xf32, #tpu.memory_space<vmem>>, %arg2: memref<128x128xf32, #tpu.memory_space<vmem>>, %arg3: memref<1x128xf32, #tpu.memory_space<vmem>>, %arg4: memref<1x128xf32, #tpu.memory_space<vmem>>, %arg5: memref<8x128xf32, #tpu.memory_space<vmem>>, %arg6: memref<8x128xf32, #tpu.memory_space<vmem>>) attributes {dimension_semantics = [#tpu.dimension_semantics<parallel>], iteration_bounds = array<i64: 3>, scalar_prefetch = 0 : i64, scratch_operands = 0 : i64, tpu.core_type = #tpu.core_type<tc>, window_params = [{pipeline_mode = #tpu.pipeline_mode<synchronous>, transform_indices = @transform_0, window_bounds = array<i64: 8, 128>}, {transform_indices = @transform_1, window_bounds = array<i64: 128, 128>}, {transform_indices = @transform_2, window_bounds = array<i64: 1, 128>}, {transform_indices = @transform_3, window_bounds = array<i64: 1, 128>}, {transform_indices = @transform_4, window_bounds = array<i64: 8, 128>}, {transform_indices = @transform_5, window_bounds = array<i64: 8, 128>}]} {
    %c2_i32 = arith.constant 2 : i32
    %0 = arith.cmpi slt, %arg0, %c2_i32 : i32
    %1 = arith.extui %0 : i1 to i32
    %c0_i32 = arith.constant 0 : i32
    %2 = arith.cmpi ne, %1, %c0_i32 : i32
    scf.if %2 {
      %c0 = arith.constant 0 : index
      %c0_2 = arith.constant 0 : index
      %6 = vector.load %arg1[%c0, %c0_2] : memref<8x128xf32, #tpu.memory_space<vmem>>, vector<8x128xf32>
      %c0_3 = arith.constant 0 : index
      %c0_4 = arith.constant 0 : index
      %7 = vector.load %arg2[%c0_3, %c0_4] : memref<128x128xf32, #tpu.memory_space<vmem>>, vector<128x128xf32>
      %cst = arith.constant dense<0.000000e+00> : vector<8x128xf32>
      %8 = tpu.matmul %6, %7, %cst {dimension_numbers = #tpu.dot_dimension_numbers<[1], [0], [0], [1], [0, 0, 1, 1], [], []>} : vector<8x128xf32>, vector<128x128xf32>, vector<8x128xf32> -> vector<8x128xf32>
      %cst_5 = arith.constant dense<0.000000e+00> : vector<128xf32>
      %9 = vector.multi_reduction <add>, %8, %cst_5 [0] : vector<8x128xf32> to vector<128xf32>
      %10 = vector.shape_cast %9 : vector<128xf32> to vector<1x128xf32>
      %cst_6 = arith.constant 1.250000e-01 : f32
      %11 = vector.broadcast %cst_6 : f32 to vector<1x128xf32>
      %12 = arith.mulf %10, %11 : vector<1x128xf32>
      %13 = vector.broadcast %12 : vector<1x128xf32> to vector<8x128xf32>
      %14 = arith.subf %8, %13 : vector<8x128xf32>
      %15 = arith.mulf %14, %14 : vector<8x128xf32>
      %cst_7 = arith.constant dense<0.000000e+00> : vector<128xf32>
      %16 = vector.multi_reduction <add>, %15, %cst_7 [0] : vector<8x128xf32> to vector<128xf32>
      %17 = vector.shape_cast %16 : vector<128xf32> to vector<1x128xf32>
      %cst_8 = arith.constant 1.250000e-01 : f32
      %18 = vector.broadcast %cst_8 : f32 to vector<1x128xf32>
      %19 = arith.mulf %17, %18 : vector<1x128xf32>
      %c0_9 = arith.constant 0 : index
      %c0_10 = arith.constant 0 : index
      %20 = vector.load %arg3[%c0_9, %c0_10] : memref<1x128xf32, #tpu.memory_space<vmem>>, vector<1x128xf32>
      %cst_11 = arith.constant 9.99999974E-6 : f32
      %21 = vector.broadcast %cst_11 : f32 to vector<1x128xf32>
      %22 = arith.addf %19, %21 : vector<1x128xf32>
      %23 = math.rsqrt %22 : vector<1x128xf32>
      %24 = arith.mulf %20, %23 : vector<1x128xf32>
      %25 = vector.broadcast %24 : vector<1x128xf32> to vector<8x128xf32>
      %26 = arith.mulf %14, %25 : vector<8x128xf32>
      %c0_12 = arith.constant 0 : index
      %c0_13 = arith.constant 0 : index
      %27 = vector.load %arg4[%c0_12, %c0_13] : memref<1x128xf32, #tpu.memory_space<vmem>>, vector<1x128xf32>
      %28 = vector.broadcast %27 : vector<1x128xf32> to vector<8x128xf32>
      %29 = arith.addf %26, %28 : vector<8x128xf32>
      %cst_14 = arith.constant 0.000000e+00 : f32
      %30 = vector.broadcast %cst_14 : f32 to vector<8x128xf32>
      %31 = arith.maximumf %29, %30 : vector<8x128xf32>
      %c0_15 = arith.constant 0 : index
      %c0_16 = arith.constant 0 : index
      %32 = vector.load %arg6[%c0_15, %c0_16] : memref<8x128xf32, #tpu.memory_space<vmem>>, vector<8x128xf32>
      tpu.vector_store %arg6[%c0_15, %c0_16], %31 {strides = array<i32>} : memref<8x128xf32, #tpu.memory_space<vmem>>, vector<8x128xf32>,
    } else {
    }
    %c2_i32_0 = arith.constant 2 : i32
    %3 = arith.cmpi sge, %arg0, %c2_i32_0 : i32
    %4 = arith.extui %3 : i1 to i32
    %c0_i32_1 = arith.constant 0 : i32
    %5 = arith.cmpi ne, %4, %c0_i32_1 : i32
    scf.if %5 {
      %c0 = arith.constant 0 : index
      %c0_2 = arith.constant 0 : index
      %6 = vector.load %arg5[%c0, %c0_2] : memref<8x128xf32, #tpu.memory_space<vmem>>, vector<8x128xf32>
      %c0_3 = arith.constant 0 : index
      %c0_4 = arith.constant 0 : index
      %7 = vector.load %arg6[%c0_3, %c0_4] : memref<8x128xf32, #tpu.memory_space<vmem>>, vector<8x128xf32>
      tpu.vector_store %arg6[%c0_3, %c0_4], %6 {strides = array<i32>} : memref<8x128xf32, #tpu.memory_space<vmem>>, vector<8x128xf32>,
    } else {
    }
    return
  }
  func.func @transform_0(%arg0: i32) -> (i32, i32) {
    %c0_i32 = arith.constant 0 : i32
    %c0_i32_0 = arith.constant 0 : i32
    %c0_i32_1 = arith.constant 0 : i32
    return %c0_i32, %c0_i32_0 : i32, i32
  }
  func.func @transform_1(%arg0: i32) -> (i32, i32) {
    %c1_i32 = arith.constant 1 : i32
    %0 = arith.minsi %arg0, %c1_i32 : i32
    %c0_i32 = arith.constant 0 : i32
    %c0_i32_0 = arith.constant 0 : i32
    return %c0_i32, %0 : i32, i32
  }
  func.func @transform_2(%arg0: i32) -> (i32, i32) {
    %c1_i32 = arith.constant 1 : i32
    %0 = arith.minsi %arg0, %c1_i32 : i32
    %c0_i32 = arith.constant 0 : i32
    %c0_i32_0 = arith.constant 0 : i32
    return %c0_i32, %0 : i32, i32
  }
  func.func @transform_3(%arg0: i32) -> (i32, i32) {
    %c1_i32 = arith.constant 1 : i32
    %0 = arith.minsi %arg0, %c1_i32 : i32
    %c0_i32 = arith.constant 0 : i32
    %c0_i32_0 = arith.constant 0 : i32
    return %c0_i32, %0 : i32, i32
  }
  func.func @transform_4(%arg0: i32) -> (i32, i32) {
    %c2_i32 = arith.constant 2 : i32
    %0 = arith.subi %arg0, %c2_i32 : i32
    %c0_i32 = arith.constant 0 : i32
    %1 = arith.maxsi %0, %c0_i32 : i32
    %c0_i32_0 = arith.constant 0 : i32
    %c0_i32_1 = arith.constant 0 : i32
    return %c0_i32_0, %1 : i32, i32
  }
  func.func @transform_5(%arg0: i32) -> (i32, i32) {
    %c0_i32 = arith.constant 0 : i32
    %c0_i32_0 = arith.constant 0 : i32
    return %c0_i32, %arg0 : i32, i32
  }
}

</mosaic_0001>

<bundles_post_ra>
// kernel: tpu_custom_call.1
= control target key start
LH: loop header
LB: loop body
LE: loop exit
PB: predicated region body
PF: predicated region fallthrough
CT: control target
= control target key end

     0   :  { %s1399_s0 = inlined_call_operand.hbm [shape: f32[8,128], index: 0, kind: input, shape index: {}]   ;;  %s1400_s1 = inlined_call_operand.hbm [shape: f32[128,256], index: 1, kind: input, shape index: {}]   ;;  %s1401_s2 = inlined_call_operand.vmem [shape: f32[1,256], index: 2, kind: input, shape index: {}]   ;;  %s1402_s3 = inlined_call_operand.vmem [shape: f32[1,256], index: 3, kind: input, shape index: {}]   ;;  %s1403_s4 = inlined_call_operand.hbm [shape: f32[8,128], index: 4, kind: input, shape index: {}]   ;;  %s1404_s5 = inlined_call_operand.hbm [shape: f32[8,384], index: 5, kind: output, shape index: {}]  }
   0x1   :  { %1414 = sst [smem:[#allocation18_spill]] %s1399_s0 }
   0x2   :  { %1415 = sst [smem:[#allocation19_spill]] %s1400_s1 }
   0x3   :  { %10 = vsyncpa [#allocation3], 0 }
   0x4   :  { %11 = vsyncpa [#allocation6], 0 }
   0x5   :  { %13 = vsyncpa [#allocation6 + $0x1], 0 }
   0x6   :  { %14 = vsyncpa [#allocation4], 0 }
   0x7   :  { %16 = vsyncpa [#allocation4 + $0x1], 0  ;;  %s1074_s18 = smov 0   ;;  %s1076_s19 = smov 0  }
   0x8   :  { %s1078_s20 = smov 0   ;;  %s1080_s21 = smov 0  }
   0x9   :  { %s1082_s22 = smov 0   ;;  %s1084_s23 = smov 0  }
   0xa   :  { %s1086_s24 = smov 0   ;;  %s1088_s25 = smov 0  }
   0xb   :  { %s1090_s26 = smov 0   ;;  %s1092_s27 = smov 0  }
   0xc LB: > { %1416 = sst [smem:[#allocation13_spill]] %s1017_s23  ;;  %s1125_s28 = sadd.s32 1, %s1033_s27   ;;  %s1033_s27 = sphi %s1092_s27, %s1453_s27   ;;  %s1029_s26 = sphi %s1090_s26, %s1452_s26   ;;  %s1025_s25 = sphi %s1088_s25, %s1451_s25   ;;  %s1021_s24 = sphi %s1086_s24, %s1450_s24   ;;  %s1017_s23 = sphi %s1084_s23, %s1442_s23   ;;  %s1013_s22 = sphi %s1082_s22, %s1449_s22   ;;  %s1009_s21 = sphi %s1080_s21, %s1448_s21   ;;  %s1005_s20 = sphi %s1078_s20, %s1447_s20   ;;  %s1001_s19 = sphi %s1076_s19, %s1446_s19   ;;  %s997_s18 = sphi %s1074_s18, %s1445_s18  }
   0xd   : > { %1417 = sst [smem:[#allocation14_spill]] %s1029_s26  ;;  %p47_p0 = scmp.lt.s32.totalorder %s1033_s27, 1 }
   0xe   : > { %p49_p1 = scmp.lt.s32.totalorder %s1125_s28, 1  ;;  %s54_s29 = sadd.s32 1, %s1029_s26 }
   0xf   : > { %s48_s30 = scalar_select %p47_p0, %s1033_s27, 1 }
  0x10   : > { %s50_s6 = scalar_select %p49_p1, %s1125_s28, 1 }
  0x11   : > { %p61_p2 = scmp.ne.s32.totalorder %s1029_s26, %s1025_s25  ;;  %p1406_p3 = scmp.eq.s32.totalorder %s1033_s27, 0 }
  0x12   : > { %s51_s7 = ssub.s32 %s48_s30, %s50_s6  ;;  %p1405_p6 = scmp.lt.s32.totalorder %s1033_s27, 3 }
  0x13   : > { %p52_p4 = scmp.eq.s32.totalorder %s51_s7, 0  ;;  %p63_p5 = por %p1406_p3, %p61_p2 }
  0x14   : > { %s220_s8 = sand.u32 1, %s1033_s27   ;;  %s222_s10 = sand.u32 1, %s1029_s26  }
  0x15   : > { %s1140_s9 = scalar_select %p52_p4, %s1029_s26, %s54_s29  }
  0x16   : > { %s639_s11 = sshll.u32 %s222_s10, 7  ;;  %s640_s12 = sshll.u32 %s48_s30, 7 }
  0x17   : > { %1418 = sst [smem:[#allocation15_spill]] %s1140_s9  ;;  %s224_s16 = scalar_lea.vmem [#allocation5], %s639_s11 }
  0x18   : > { %s1419_s1 = sld [smem:[#allocation19_spill]]  ;;  %s232_s17 = sshll.u32 %s224_s16, 4  ;;  %s1154_s17 = int_to_ptr.vmem [resolvable:$true] %s232_s17 }
  0x19   : > { %p1150_p7 = pnand %p1405_p6, %p63_p5  ;;  %s1156_s29 = scalar_lea.sflag [#allocation6], %s220_s8 }
  0x1b   : > { %p833_p9 = pneg %p1150_p7 }
  0x1e   : > { %s1146_s15 = scalar_lea.hbm %s1419_s1, %s640_s12  ;;  %s836_s11 = scalar_lea.hbm %s1419_s1, 4096 }
  0x1f   : > { %s831_s30 = scalar_lea.hbm %s1146_s15, 2048  ;;  %p837_p12 = scmp.lt.s32.totalorder %s1146_s15, %s1419_s1 }
  0x20   : > { %p832_p8 = scmp.ne.s32.totalorder %s1146_s15, %s831_s30  ;;  %p838_p13 = scmp.lt.s32.totalorder %s836_s11, %s831_s30 }
  0x22   : > { %p834_p10 = pnand %p833_p9, %p832_p8  ;;  %p839_p0 = por %p838_p13, %p837_p12 }
  0x24   : > { %p835_p11 = pneg %p834_p10 }
  0x26   : > { %p840_p1 = pnand %p839_p0, %p835_p11 }
  0x28   : > { %843 = shalt.err (!%p840_p1)
}
  0x29   : > { %s844_s8 = scalar_lea.vmem %s1154_s17, 2048  ;;  %s1035_s14 = smov [#allocation5]  }
  0x2a   : > { %p845_p2 = scmp.ne.s32.totalorder %s1154_s17, %s844_s8  ;;  %s849_s16 = sshll.u32 %s1035_s14, 4  ;;  %s850_s16 = int_to_ptr.vmem [resolvable:$false] %s849_s16 }
  0x2b   : > { %s851_s7 = scalar_lea.vmem %s850_s16, 4096  ;;  %p852_p8 = scmp.lt.s32.totalorder %s1154_s17, %s850_s16 }
  0x2c   : > { %p847_p4 = pnand %p845_p2, %p833_p9  ;;  %p853_p10 = scmp.lt.s32.totalorder %s851_s7, %s844_s8 }
  0x2e   : > { %p848_p5 = pneg %p847_p4  ;;  %p854_p6 = por %p853_p10, %p852_p8 }
  0x30   : > { %p855_p3 = pnand %p854_p6, %p848_p5 }
  0x32   : > { %858 = shalt.err (!%p855_p3)
}
  0x33   : > { %s1036_s30 = smov 256   ;;  %s1037_s10 = smov 128  }
  0x34   : > { %s1038_s11 = smov 8   ;;  %s1178_s12 = sadd.s32 4294967295, %s1033_s27  }
  0x35   : > { %731 = dma.hbm_to_vmem [thread:$0]  (!%p1150_p7), %s1146_s15, 2048, %s1154_s17, %s1156_s29, %s1036_s30, %s1037_s10, %s1038_s11  }
  0x36   : > { %p67_p3 = scmp.ne.s32.totalorder %s1025_s25, %s1021_s24  ;;  %p1410_p6 = scmp.eq.s32.totalorder %s1178_s12, 0 }
  0x37   : > { %p159_p9 = scmp.ne.s32.totalorder %s1013_s22, %s1009_s21  ;;  %s169_s13 = ssub.s32 %s1033_s27, %s1125_s28 }
  0x38   : > { %p1189_p11 = por %p1410_p6, %p67_p3  ;;  %p170_p12 = scmp.eq.s32.totalorder %s169_s13, 0 }
  0x39   : > { %p1195_p7 = por %p159_p9, %p1410_p6  ;;  %s172_s17 = sadd.s32 1, %s1005_s20 }
  0x3a   : > { %s1421_s8 = scalar_select %p1189_p11, 1, 0 }
  0x3b   : > { %s1422_s15 = scalar_select %p1195_p7, 1, 0 }
  0x3c   : > { %s1201_s6 = scalar_select %p170_p12, %s1005_s20, %s172_s17  }
  0x3d   : > { %p182_p13 = scmp.ne.s32.totalorder %s1005_s20, %s1001_s19  ;;  %p183_p0 = scmp.eq.s32.totalorder %s1178_s12, 2 }
  0x3e   : > { %1423 = sst [smem:[#allocation16_spill]] %s1201_s6  ;;  %p636_p1 = scmp.ge.s32.totalorder %s1033_s27, 1 }
  0x3f   : > { %p196_p2 = scmp.lt.s32.totalorder %s1033_s27, 4  ;;  %p1208_p4 = por %p183_p0, %p182_p13 }
  0x40   : > { %s1039_s14 = smov [#allocation2]   ;;  %s633_s30 = sadd.s32 4294967294, %s1033_s27  }
  0x41   : > { %s1424_s21 = scalar_select %p1208_p4, 1, 0 }
  0x42   : > { %p1212_p5 = pnand %p636_p1, %p196_p2  ;;  %s209_s16 = sshll.u32 %s1039_s14, 4  ;;  %s210_s16 = int_to_ptr.vmem [resolvable:$true] %s209_s16 }
  0x43   : > { %s635_s10 = sadd.s32 4294967294, %s1125_s28  ;;  %p138_p3 = scmp.gt.s32.totalorder %s633_s30, 0 }
  0x44   : > { %s1425_s24 = scalar_select %p1212_p5, 1, 0 }
  0x45   : > { %p724_p8 = pneg %p1212_p5  ;;  %s870_s11 = scalar_lea.vmem %s210_s16, 128 }
  0x46   : > { %p871_p12 = scmp.ne.s32.totalorder %s210_s16, %s870_s11  ;;  %p878_p1 = scmp.lt.s32.totalorder %s210_s16, %s210_s16 }
  0x47   : > { %p1220_p10 = pnand %p724_p8, %p1410_p6  ;;  %p879_p2 = scmp.lt.s32.totalorder %s870_s11, %s870_s11 }
  0x49   : > { %p861_p9 = pneg %p1220_p10  ;;  %p880_p4 = por %p879_p2, %p878_p1 }
  0x4b   : > { %p873_p13 = pnand %p871_p12, %p861_p9 }
  0x4d   : > { %p874_p0 = pneg %p873_p13 }
  0x4f   : > { %p881_p7 = pnand %p880_p4, %p874_p0 }
  0x51   : > { %884 = shalt.err (!%p881_p7)
}
  0x52   : > { %s1427_s0 = sld [smem:[#allocation18_spill]]  ;;  %p141_p8 = scmp.gt.s32.totalorder %s635_s10, 0 }
  0x53   : > { %s139_s14 = scalar_select %p138_p3, %s633_s30, 0 }
  0x54   : > { %s146_s11 = sadd.s32 1, %s1017_s23  ;;  %p153_p4 = scmp.ne.s32.totalorder %s1017_s23, %s1013_s22 }
  0x55   : > { %p188_p7 = scmp.ne.s32.totalorder %s1001_s19, %s997_s18  ;;  %s1455_s10 = smov (!%p141_p8, %s635_s10), 0 }
  0x56   : > { %p1428_p9 = scmp.eq.s32.totalorder %s1033_s27, 0  ;;  %p189_p13 = scmp.eq.s32.totalorder %s633_s30, 2 }
  0x57   : > { %s143_s7 = ssub.s32 %s139_s14, %s1455_s10  ;;  %s264_s13 = sand.u32 1, %s1017_s23  }
  0x58   : > { %727 = dma.hbm_to_vmem [thread:$0]  (!%p1220_p10), %s1427_s0, 128, %s210_s16, [#allocation3]  }
  0x59   : > { %p155_p12 = por %p153_p4, %p1428_p9  ;;  %p144_p0 = scmp.eq.s32.totalorder %s143_s7, 0 }
  0x5a   : > { %p1241_p1 = por %p189_p13, %p188_p7  ;;  %s641_s1 = sshll.u32 %s264_s13, 3 }
  0x5b   : > { %s643_s9 = sshll.u32 %s139_s14, 7  ;;  %s266_s30 = scalar_lea.vmem [#allocation7], %s641_s1 }
  0x5c   : > { %s1429_s17 = scalar_select %p1241_p1, 1, 0 }
  0x5d   : > { %s1246_s16 = scalar_select %p144_p0, %s1017_s23, %s146_s11  }
  0x5e   : > { %s1251_s6 = scalar_lea.hbm %s1403_s4, %s643_s9  ;;  %s276_s10 = sshll.u32 %s266_s30, 4  ;;  %s277_s10 = int_to_ptr.vmem [resolvable:$true] %s276_s10 }
  0x5f   : > { %1430 = sst [smem:[#allocation17_spill]] %s1246_s16  ;;  %p1431_p10 = scmp.lt.s32.totalorder %s1033_s27, 3 }
  0x60   : > { %s885_s14 = scalar_lea.hbm %s1251_s6, 128  ;;  %s890_s9 = scalar_lea.hbm %s1403_s4, 128 }
  0x61   : > { %p1255_p3 = pnand %p1431_p10, %p155_p12  ;;  %p886_p2 = scmp.ne.s32.totalorder %s1251_s6, %s885_s14 }
  0x62   : > { %p891_p9 = scmp.lt.s32.totalorder %s1251_s6, %s1403_s4  ;;  %p892_p12 = scmp.lt.s32.totalorder %s890_s9, %s885_s14 }
  0x63   : > { %p887_p8 = pneg %p1255_p3 }
  0x64   : > { %p893_p13 = por %p892_p12, %p891_p9 }
  0x65   : > { %p888_p4 = pnand %p887_p8, %p886_p2 }
  0x67   : > { %p889_p7 = pneg %p888_p4 }
  0x69   : > { %p894_p0 = pnand %p893_p13, %p889_p7 }
  0x6b   : > { %897 = shalt.err (!%p894_p0)
}
  0x6c   : > { %s898_s13 = scalar_lea.vmem %s277_s10, 128  ;;  %s1040_s30 = smov [#allocation7]  }
  0x6d   : > { %p899_p10 = scmp.ne.s32.totalorder %s277_s10, %s898_s13  ;;  %s903_s16 = sshll.u32 %s1040_s30, 4  ;;  %s904_s16 = int_to_ptr.vmem [resolvable:$false] %s903_s16 }
  0x6e   : > { %s905_s23 = scalar_lea.vmem %s904_s16, 256  ;;  %p906_p2 = scmp.lt.s32.totalorder %s277_s10, %s904_s16 }
  0x6f   : > { %p901_p6 = pnand %p899_p10, %p887_p8  ;;  %p907_p4 = scmp.lt.s32.totalorder %s905_s23, %s898_s13 }
  0x71   : > { %p902_p1 = pneg %p901_p6  ;;  %p908_p11 = por %p907_p4, %p906_p2 }
  0x73   : > { %p909_p5 = pnand %p908_p11, %p902_p1 }
  0x75   : > { %912 = shalt.err (!%p909_p5)
}
  0x76   : > { %734 = dma.hbm_to_vmem [thread:$0]  (!%p1255_p3), %s1251_s6, 128, %s277_s10, %s1156_s29  }
  0x77   : > { %p1433_p7 = scmp.ne.s32.totalorder %s1425_s24, 0 }
  0x78   : > { %p1434_p8 = scmp.eq.s32.totalorder (!%p1433_p7), %s1178_s12, 0 }
  0x79   : > { %285 = sbr.rel (%p1433_p7) target bundleno = 462 (0x1ce), region = 40 }
  0x7e   : > { %980 = dma.done.wait (%p1434_p8), [#allocation3], 128   ;;  %p1435_p6 = pmov %p1434_p8 }
  0x7f   : > { %s291_s23 = sand.u32 1, %s1178_s12   ;;  %s293_s16 = sand.u32 1, %s1025_s25  }
  0x80   : > { %982 = vsyncadd (%p1435_p6), [#allocation3], 4294967168  ;;  %s646_s14 = sshll.u32 %s293_s16, 7  ;;  %s292_s0 = scalar_lea.sflag [#allocation6], %s291_s23 }
  0x81   : > { %s1282_s7 = scalar_lea.vmem [#allocation5], %s646_s14  ;;  %p1436_p11 = scmp.ne.s32.totalorder %s1421_s8, 0 }
  0x83   : > { %984 = dma.done.wait (%p1436_p11), %s292_s0, 2048  }
  0x84   : > { %986 = vsyncadd (%p1436_p11), %s292_s0, 4294965248  ;;  %s302_s29 = sand.u32 1, %s1013_s22   ;;  %p1437_p5 = scmp.ne.s32.totalorder %s1422_s15, 0 }
  0x85   : > { %s1289_s6 = sshll.u32 %s302_s29, 3 }
  0x86   : > { %s304_s24 = scalar_lea.vmem [#allocation7], %s1289_s6 }
  0x87   : > { %988 = dma.done.wait (%p1437_p5), %s292_s0, 128  }
  0x88   : > { %990 = vsyncadd (%p1437_p5), %s292_s0, 4294967168  ;;  %s343_s10 = sand.u32 1, %s1001_s19   ;;  %p348_p1 = scmp.lt.s32.totalorder %s1178_s12, 1 }
  0x89   : > { %s648_s8 = sshll.u32 %s343_s10, 3  ;;  %p655_p3 = scmp.ge.s32.totalorder %s1178_s12, 2 }
  0x8a   : > { %s349_s26 = scalar_select %p348_p1, %s1178_s12, 1 }
  0x8b   : > { %s1311_s23 = scalar_lea.vmem [#allocation8], %s648_s8  ;;  %368 = sbr.rel (%p655_p3) target bundleno = 429 (0x1ad), region = 56 }
  0x8c   : > { %s1457_s26 = smov (!%p348_p1, %s349_s26), 1 }
  0x8d   : > { %s352_s1 = scalar_lea.vmem %s1401_s2, %s1457_s26  ;;  %s359_s30 = scalar_lea.vmem %s1402_s3, %s1457_s26 }
  0x90   : > { %v385_v0 = vld [vmem:[%s1282_s7 + $0x78] sm:$0xff]  ;;  %v1041_v1 = vmov 0.0   ;;  %v384_v2 = vld [vmem:[%s1282_s7 + $0x70] sm:$0xff]  ;;  %vm1042_vm0 = vmmov 0   ;;  %v383_v3 = vld [vmem:[%s1282_s7 + $0x68] sm:$0xff]  ;;  %v477_v37 = vlaneseq }
  0x91   : > { %679 = vmatprep.subr.mxu0 %v1041_v1  ;;  %711 = vmatprep.mubr.msk.f32.mxu0 %vm1042_vm0, %v1041_v1  ;;  %v382_v4 = vld [vmem:[%s1282_s7 + $0x60] sm:$0xff]  ;;  %v381_v5 = vld [vmem:[%s1282_s7 + $0x58] sm:$0xff]  ;;  %v380_v6 = vld [vmem:[%s1282_s7 + $0x50] sm:$0xff] }
  0x92   : > { %680 = vmatpush3.msra.mxu0 %v385_v0  ;;  %v379_v7 = vld [vmem:[%s1282_s7 + $0x48] sm:$0xff]  ;;  %v378_v8 = vld [vmem:[%s1282_s7 + $0x40] sm:$0xff]  ;;  %v377_v9 = vld [vmem:[%s1282_s7 + $0x38] sm:$0xff]  ;;  %v478_v38 = vshrl.u32 %v477_v37, 7 }
  0x93   : > { %681 = vmatprep.subr.mxu0 %v1041_v1  ;;  %v376_v10 = vld [vmem:[%s1282_s7 + $0x30] sm:$0xff]  ;;  %v375_v11 = vld [vmem:[%s1282_s7 + $0x28] sm:$0xff]  ;;  %v374_v12 = vld [vmem:[%s1282_s7 + $0x20] sm:$0xff] }
  0x94   : > { %682 = vmatpush3.msra.mxu0 %v384_v2  ;;  %v373_v13 = vld [vmem:[%s1282_s7 + $0x18] sm:$0xff]  ;;  %v372_v14 = vld [vmem:[%s1282_s7 + $0x10] sm:$0xff]  ;;  %v371_v15 = vld [vmem:[%s1282_s7 + $0x8] sm:$0xff]  ;;  %v479_v40 = vsub.s32 0, %v478_v38 }
  0x95   : > { %683 = vmatprep.subr.mxu0 %v1041_v1  ;;  %v370_v16 = vld [vmem:[%s1282_s7] sm:$0xff]  ;;  %v369_v17 = vld [vmem:[#allocation2] sm:$0xff] }
  0x96   : > { %684 = vmatpush3.msra.mxu0 %v383_v3  ;;  %v472_v39 = vld [vmem:[%s352_s1] sm:$0x1] }
  0x97   : > { %685 = vmatprep.subr.mxu0 %v1041_v1  ;;  %v656_v44 = vld [vmem:[%s359_s30] ss:$0 sm:$0xff] }
  0x98   : > { %686 = vmatpush3.msra.mxu0 %v382_v4 }
  0x99   : > { %687 = vmatprep.subr.mxu0 %v1041_v1 }
  0x9a   : > { %688 = vmatpush3.msra.mxu0 %v381_v5 }
  0x9b   : > { %689 = vmatprep.subr.mxu0 %v1041_v1 }
  0x9c   : > { %690 = vmatpush3.msra.mxu0 %v380_v6 }
  0x9d   : > { %691 = vmatprep.subr.mxu0 %v1041_v1 }
  0x9e   : > { %692 = vmatpush3.msra.mxu0 %v379_v7 }
  0x9f   : > { %693 = vmatprep.subr.mxu0 %v1041_v1 }
  0xa0   : > { %694 = vmatpush3.msra.mxu0 %v378_v8 }
  0xa1   : > { %695 = vmatprep.subr.mxu0 %v1041_v1 }
  0xa2   : > { %696 = vmatpush3.msra.mxu0 %v377_v9 }
  0xa3   : > { %697 = vmatprep.subr.mxu0 %v1041_v1 }
  0xa4   : > { %698 = vmatpush3.msra.mxu0 %v376_v10 }
  0xa5   : > { %699 = vmatprep.subr.mxu0 %v1041_v1 }
  0xa6   : > { %700 = vmatpush3.msra.mxu0 %v375_v11 }
  0xa7   : > { %701 = vmatprep.subr.mxu0 %v1041_v1 }
  0xa8   : > { %702 = vmatpush3.msra.mxu0 %v374_v12 }
  0xa9   : > { %703 = vmatprep.subr.mxu0 %v1041_v1 }
  0xaa   : > { %704 = vmatpush3.msra.mxu0 %v373_v13 }
  0xab   : > { %705 = vmatprep.subr.mxu0 %v1041_v1 }
  0xac   : > { %706 = vmatpush3.msra.mxu0 %v372_v14 }
  0xad   : > { %707 = vmatprep.subr.mxu0 %v1041_v1 }
  0xae   : > { %708 = vmatpush3.msra.mxu0 %v371_v15 }
  0xaf   : > { %709 = vmatprep.subr.mxu0 %v1041_v1 }
  0xb0   : > { %710 = vmatpush3.msra.mxu0 %v370_v16 }
  0xb1   : > { %712 = vmatmul.mubr.f32.vlgmr.msra.gmra.mxu0 %v369_v17 }
 0x171   : > { %v452_v18 = vpop.f32.mrf.mxu0 }
 0x172   : > { %v456_v19 = vrot.slane %v452_v18, 4 }
 0x173   : > { %v713_v20 = vpop.f32.mrf.mxu0 }
 0x174   : > { %v457_v21 = vadd.f32 %v456_v19, %v452_v18 }
 0x176   : > { %v458_v22 = vrot.slane %v457_v21, 2 }
 0x178   : > { %v459_v23 = vadd.f32 %v458_v22, %v457_v21 }
 0x17a   : > { %v460_v24 = vrot.slane %v459_v23, 1 }
 0x17c   : > { %v461_v25 = vadd.f32 %v460_v24, %v459_v23 }
 0x17e   : > { %v462_v26 = vmul.f32 0.125, %v461_v25 }
 0x180   : > { %v463_v27 = vsub.f32 %v452_v18, %v462_v26 }
 0x182   : > { %v464_v28 = vmul.f32 %v463_v27, %v463_v27 }
 0x184   : > { %v465_v29 = vrot.slane %v464_v28, 4 }
 0x186   : > { %v466_v30 = vadd.f32 %v465_v29, %v464_v28 }
 0x188   : > { %v467_v31 = vrot.slane %v466_v30, 2 }
 0x18a   : > { %v468_v32 = vadd.f32 %v467_v31, %v466_v30 }
 0x18c   : > { %v469_v33 = vrot.slane %v468_v32, 1 }
 0x18e   : > { %v470_v34 = vadd.f32 %v469_v33, %v468_v32 }
 0x190   : > { %v471_v35 = vmul.f32 0.125, %v470_v34 }
 0x192   : > { %v473_v36 = vadd.f32 1e-05, %v471_v35 }
 0x194   : > { %829 = vrsqrt.f32 %v473_v36 }
 0x1a1   : > { %v830_v41 = vpop.eup %829 }
 0x1a2   : > { %v475_v42 = vmul.f32 %v830_v41, %v472_v39 }
 0x1a4   : > { %v480_v43 = vrot.slane %v475_v42, %v479_v40 }
 0x1a6   : > { %v482_v45 = vmul.f32 %v480_v43, %v463_v27 }
 0x1a8   : > { %v490_v46 = vadd.f32 %v656_v44, %v482_v45 }
 0x1aa   : > { %v491_v47 = vmax.f32 %v490_v46, 0.0 }
 0x1ac   : > { %492 = vst [vmem:[%s1311_s23] sm:$0xff] %v491_v47 }
 0x1ad PF: > { %p657_p9 = scmp.lt.s32.totalorder %s1178_s12, 2 }
 0x1af   : > { %496 = sbr.rel (%p657_p9) target bundleno = 438 (0x1b6), region = 60 }
 0x1b4   : > { %v497_v48 = vld [vmem:[%s304_s24] sm:$0xff] }
 0x1b5   : > { %498 = vst [vmem:[%s1311_s23] sm:$0xff] %v497_v48 }
 0x1b6 PF: > { %s659_s29 = sshll.u32 %s1178_s12, 7  ;;  %s513_s11 = sshll.u32 %s1311_s23, 4  ;;  %s514_s11 = int_to_ptr.vmem [resolvable:$true] %s513_s11 }
 0x1b7   : > { %s511_s9 = scalar_lea.hbm %s1404_s5, %s659_s29  ;;  %s500_s1 = scalar_lea.sflag [#allocation4], %s343_s10 }
 0x1b8   : > { %s913_s13 = scalar_lea.vmem %s514_s11, 128  ;;  %p1438_p13 = scmp.ne.s32.totalorder %s1424_s21, 0 }
 0x1b9   : > { %p914_p12 = scmp.ne.s32.totalorder %s514_s11, %s913_s13  ;;  %s1043_s6 = smov [#allocation8]  }
 0x1ba   : > { %s917_s24 = sshll.u32 %s1043_s6, 4  ;;  %s918_s24 = int_to_ptr.vmem [resolvable:$false] %s917_s24 }
 0x1bb   : > { %p915_p0 = pnand %p914_p12, %p1438_p13  ;;  %s919_s15 = scalar_lea.vmem %s918_s24, 256 }
 0x1bc   : > { %p920_p2 = scmp.lt.s32.totalorder %s514_s11, %s918_s24  ;;  %p921_p4 = scmp.lt.s32.totalorder %s919_s15, %s913_s13 }
 0x1bd   : > { %p916_p10 = pneg %p915_p0 }
 0x1be   : > { %p922_p7 = por %p921_p4, %p920_p2 }
 0x1c0   : > { %p923_p8 = pnand %p922_p7, %p916_p10 }
 0x1c2   : > { %926 = shalt.err (!%p923_p8)
}
 0x1c3   : > { %s927_s12 = scalar_lea.hbm %s511_s9, 128  ;;  %s931_s23 = scalar_lea.hbm %s1404_s5, 384 }
 0x1c4   : > { %p928_p6 = scmp.ne.s32.totalorder %s511_s9, %s927_s12  ;;  %p932_p1 = scmp.lt.s32.totalorder %s511_s9, %s1404_s5 }
 0x1c5   : > { %p933_p3 = scmp.lt.s32.totalorder %s931_s23, %s927_s12 }
 0x1c6   : > { %p929_p11 = pnand %p928_p6, %p1438_p13 }
 0x1c7   : > { %p934_p9 = por %p933_p3, %p932_p1 }
 0x1c8   : > { %p930_p5 = pneg %p929_p11 }
 0x1ca   : > { %p935_p12 = pnand %p934_p9, %p930_p5 }
 0x1cc   : > { %938 = shalt.err (!%p935_p12)
}
 0x1cd   : > { %722 = dma.vmem_to_hbm [thread:$0]  (%p1438_p13), %s514_s11, 128, %s511_s9, %s500_s1  }
 0x1ce PF: > { %p742_p0 = scmp.ge.s32.totalorder %s1033_s27, 2  ;;  %s525_s0 = sand.u32 1, %s997_s18  }
 0x1cf   : > { %p1439_p10 = scmp.ne.s32.totalorder %s1429_s17, 0  ;;  %s526_s7 = scalar_lea.sflag [#allocation4], %s525_s0 }
 0x1d1   : > { %p736_p2 = pnand %p742_p0, %p1439_p10 }
 0x1d3   : > { %p737_p4 = pneg %p736_p2 }
 0x1d5   : > { %992 = dma.done.wait (%p737_p4), %s526_s7, 128  }
 0x1d6   : > { %994 = vsyncadd (%p737_p4), %s526_s7, 4294967168  ;;  %s1440_s29 = sld [smem:[#allocation16_spill]]  ;;  %p19_p13 = scmp.ge.s32.totalorder %s1125_s28, 5  }
 0x1d7   : > { %s1441_s8 = sld [smem:[#allocation13_spill]]  ;;  %s1445_s18 = smov %s1001_s19 }
 0x1d8   : > { %s1442_s23 = sld [smem:[#allocation17_spill]]  ;;  %s1446_s19 = smov %s1005_s20 }
 0x1d9   : > { %s1443_s26 = sld [smem:[#allocation14_spill]]  ;;  %s1448_s21 = smov %s1013_s22 }
 0x1da   : > { %s1444_s9 = sld [smem:[#allocation15_spill]]  ;;  %s1450_s24 = smov %s1025_s25 }
 0x1db   : > { %s1453_s27 = smov %s1125_s28 }
 0x1dc   : > { %s1447_s20 = smov %s1440_s29  ;;  %21 = sbr.rel (!%p19_p13) target bundleno = 12 (0xc), region = 115 }
 0x1dd   : > { %s1449_s22 = smov %s1441_s8 }
 0x1df   : > { %s1451_s25 = smov %s1443_s26 }
 0x1e0   : > { %s1452_s26 = smov %s1444_s9 }
 0x1e1   :  { %531 = vsyncpa [#allocation3], 1 }
 0x1e2   :  { %533 = vsyncpa [#allocation3 + $0x1], 1 }
 0x1e3   :  { %534 = vsyncpa [#allocation6], 1 }
 0x1e4   :  { %536 = vsyncpa [#allocation6 + $0x1], 1 }
 0x1e5   :  { %537 = vsyncpa [#allocation4], 1 }
 0x1e6   :  { %539 = vsyncpa [#allocation4 + $0x1], 1 }

</bundles_post_ra>
